<compile_context>
chip_gen: v7x
topology: tpu7x:2x2x1
jax: 0.10.0
libtpu: 0.0.40
codegen_flags: <defaults>
</compile_context>

<pallas_src>
import jax
import jax.numpy as jnp
from jax.experimental import pallas as pl
from jax.experimental.pallas import tpu as pltpu

HIDDEN = 32
NUM_GAUSSIANS = 3
_TILE_CAP = 16384  # samples per grid step; ~6 MiB peak VMEM -> fits v5e/v6e/v7x defaults


def mdn_kernel(x_ref, w1_ref, b1_ref, w2_ref, b2_ref, wh_ref, bh_ref, out_ref):
    G = NUM_GAUSSIANS
    x = x_ref[...]                                    # (1, TB) batch on lanes

    # fc1 (K=1 contraction): broadcast multiply on the VPU, no MXU involvement.
    h = jnp.tanh(w1_ref[...] * x + b1_ref[...])       # (H,1)*(1,TB)+(H,1) -> (H,TB)

    # fc2: (H,H) @ (H,TB) on the MXU, lane-dense result.
    h = jnp.tanh(
        jnp.dot(w2_ref[...], h, preferred_element_type=jnp.float32) + b2_ref[...])

    # Fused heads: one (3G,H) @ (H,TB) matmul; rows ordered [alpha; mu; log-sigma].
    z = jnp.dot(wh_ref[...], h, preferred_element_type=jnp.float32) + bh_ref[...]

    # Softmax over the gaussian-component axis.  Rows 0..G-1 sit inside one
    # f32 vreg tile (sublanes 0..2), so max/sum reductions need no relayout.
    logits = z[0:G, :]
    logits = logits - jnp.max(logits, axis=0, keepdims=True)
    e = jnp.exp(logits)
    alpha = e / jnp.sum(e, axis=0, keepdims=True)     # exact divide: rows sum to 1

    # Single (3G, TB) output slab -> one output DMA per grid step.
    out_ref[0:G, :] = alpha.astype(out_ref.dtype)
    out_ref[G:2 * G, :] = z[G:2 * G, :].astype(out_ref.dtype)                # mu
    out_ref[2 * G:3 * G, :] = jnp.exp(z[2 * G:3 * G, :]).astype(out_ref.dtype)  # sigma


def _plan_tiles(n, cap=_TILE_CAP):
    """Balanced lane-dense batch tiles.  Returns (tile, padded_batch)."""
    n128 = ((n + 127) // 128) * 128           # pad batch up to a lane-dense multiple
    steps = max(1, -(-n128 // cap))           # number of grid steps
    tb = ((-(-n128 // steps) + 127) // 128) * 128
    return tb, tb * steps


def mixed_gaussian_fused(x, params, *, tb=None):
    """Runs the Pallas kernel; returns one (3G, N) slab: rows [alpha; mu; sigma].

    Batch lives on the lane axis -- consumers that can work in this layout
    (e.g. an MDN NLL kernel) should use it directly and avoid transposes.
    """
    N = x.shape[0]
    H, G = HIDDEN, NUM_GAUSSIANS

    if tb is None:
        tb, n_pad = _plan_tiles(N)
    else:
        assert tb % 128 == 0, "batch tile must be lane-dense (multiple of 128)"
        n_pad = ((N + tb - 1) // tb) * tb

    # Batch onto the lane axis; (N,1) is contiguous so the reshape is free.
    x_t = x.reshape(1, N).astype(jnp.float32)
    if n_pad != N:
        x_t = jnp.pad(x_t, ((0, 0), (0, n_pad - N)))

    # Pack parameters into few VMEM-resident operands (fused head).
    w1 = params["w1"].reshape(H, 1)
    b1 = params["b1"].reshape(H, 1)
    w2 = params["w2"]                                          # (H, H), (out, in)
    b2 = params["b2"].reshape(H, 1)
    wh = jnp.concatenate([params["walpha"], params["wmu"], params["wsigma"]],
                         axis=0)                               # (3G, H)
    bh = jnp.concatenate([params["balpha"], params["bmu"], params["bsigma"]],
                         axis=0).reshape(3 * G, 1)             # (3G, 1)

    def param_spec(shape):
        return pl.BlockSpec(shape, lambda i, _s=shape: tuple(0 for _ in _s))

    param_bytes = 4 * (w1.size + b1.size + w2.size + b2.size + wh.size + bh.size)
    cost = pl.CostEstimate(
        flops=2 * n_pad * (H + H * H + H * 3 * G),
        transcendentals=n_pad * (2 * H + 2 * G),
        bytes_accessed=4 * (n_pad + 3 * G * n_pad) + param_bytes,
    )

    grid_spec = pltpu.PrefetchScalarGridSpec(
        num_scalar_prefetch=0,
        grid=(n_pad // tb,),
        in_specs=[
            pl.BlockSpec((1, tb), lambda i: (0, i)),           # x (lane-dense)
            param_spec((H, 1)), param_spec((H, 1)),            # w1, b1
            param_spec((H, H)), param_spec((H, 1)),            # w2, b2
            param_spec((3 * G, H)), param_spec((3 * G, 1)),    # fused head W, b
        ],
        out_specs=pl.BlockSpec((3 * G, tb), lambda i: (0, i)),  # [alpha; mu; sigma]
    )

    slab = pl.pallas_call(
        mdn_kernel,
        out_shape=jax.ShapeDtypeStruct((3 * G, n_pad), jnp.float32),
        grid_spec=grid_spec,
        cost_estimate=cost,
        compiler_params=pltpu.CompilerParams(
            dimension_semantics=("parallel",),
            vmem_limit_bytes=32 * 1024 * 1024),
    )(x_t, w1, b1, w2, b2, wh, bh)

    return slab[:, :N]


def mixed_gaussian_forward(x, params, *, tb=None):
    """PyTorch-layout forward: returns (mu, sigma, alpha), each (N, G)."""
    G = NUM_GAUSSIANS
    slab = mixed_gaussian_fused(x, params, tb=tb)
    alpha = slab[0:G, :]
    mu = slab[G:2 * G, :]
    sigma = slab[2 * G:3 * G, :]
    # Transposes only here, to honor the original (N, G) module contract;
    # layout-aware consumers should use mixed_gaussian_fused() instead.
    return mu.T, sigma.T, alpha.T


def init_params(key):
    """Deterministic synthetic parameters matching nn.Linear (out, in) layout."""
    H, G = HIDDEN, NUM_GAUSSIANS
    ks = jax.random.split(key, 10)

    def lin(kw, kb, fan_in, fan_out):
        bound = 1.0 / jnp.sqrt(jnp.float32(fan_in))
        w = jax.random.uniform(kw, (fan_out, fan_in), jnp.float32, -bound, bound)
        b = jax.random.uniform(kb, (fan_out,), jnp.float32, -bound, bound)
        return w, b

    w1, b1 = lin(ks[0], ks[1], 1, H)
    w2, b2 = lin(ks[2], ks[3], H, H)
    wmu, bmu = lin(ks[4], ks[5], H, G)
    wsigma, bsigma = lin(ks[6], ks[7], H, G)
    walpha, balpha = lin(ks[8], ks[9], H, G)
    return dict(w1=w1, b1=b1, w2=w2, b2=b2,
                wmu=wmu, bmu=bmu, wsigma=wsigma, bsigma=bsigma,
                walpha=walpha, balpha=balpha)


def reference_forward(x, p):
    """Pure-JAX reference matching the PyTorch module exactly."""
    h = jnp.tanh(x @ p["w1"].T + p["b1"])
    h = jnp.tanh(h @ p["w2"].T + p["b2"])
    mu = h @ p["wmu"].T + p["bmu"]
    sigma = jnp.exp(h @ p["wsigma"].T + p["bsigma"])
    alpha = jax.nn.softmax(h @ p["walpha"].T + p["balpha"], axis=1)
    return mu, sigma, alpha


if __name__ == "__main__":
    key = jax.random.PRNGKey(0)
    kx, kp = jax.random.split(key)

    N = 300                                  # deliberately not a multiple of 128
    x = jax.random.normal(kx, (N, 1), jnp.float32)
    params = init_params(kp)

    mu, sigma, alpha = mixed_gaussian_forward(x, params)
    jax.block_until_ready((mu, sigma, alpha))

    # Sanity check against the pure-JAX reference.
    mu_r, sigma_r, alpha_r = reference_forward(x, params)
    assert mu.shape == (N, NUM_GAUSSIANS)
    assert sigma.shape == (N, NUM_GAUSSIANS)
    assert alpha.shape == (N, NUM_GAUSSIANS)
    assert jnp.allclose(mu, mu_r, atol=1e-4, rtol=1e-4), "mu mismatch"
    assert jnp.allclose(sigma, sigma_r, atol=1e-4, rtol=1e-4), "sigma mismatch"
    assert jnp.allclose(alpha, alpha_r, atol=1e-4, rtol=1e-4), "alpha mismatch"
    assert jnp.allclose(jnp.sum(alpha, axis=1), 1.0, atol=1e-5), "alpha not normalized"

    print("KERNEL_OK")
</pallas_src>

<mosaic_0001>
module attributes {stable_mosaic.version = 11 : i64} {
  func.func @mdn_kernel(%arg0: i32, %arg1: memref<1x384xf32, #tpu.memory_space<vmem>>, %arg2: memref<32x1xf32, #tpu.memory_space<vmem>>, %arg3: memref<32x1xf32, #tpu.memory_space<vmem>>, %arg4: memref<32x32xf32, #tpu.memory_space<vmem>>, %arg5: memref<32x1xf32, #tpu.memory_space<vmem>>, %arg6: memref<9x32xf32, #tpu.memory_space<vmem>>, %arg7: memref<9x1xf32, #tpu.memory_space<vmem>>, %arg8: memref<9x384xf32, #tpu.memory_space<vmem>>) attributes {dimension_semantics = [#tpu.dimension_semantics<parallel>], iteration_bounds = array<i64: 1>, scalar_prefetch = 0 : i64, scratch_operands = 0 : i64, tpu.core_type = #tpu.core_type<tc>, window_params = [{transform_indices = @transform_0, window_bounds = array<i64: 1, 384>}, {pipeline_mode = #tpu.pipeline_mode<synchronous>, transform_indices = @transform_1, window_bounds = array<i64: 32, 1>}, {pipeline_mode = #tpu.pipeline_mode<synchronous>, transform_indices = @transform_2, window_bounds = array<i64: 32, 1>}, {pipeline_mode = #tpu.pipeline_mode<synchronous>, transform_indices = @transform_3, window_bounds = array<i64: 32, 32>}, {pipeline_mode = #tpu.pipeline_mode<synchronous>, transform_indices = @transform_4, window_bounds = array<i64: 32, 1>}, {pipeline_mode = #tpu.pipeline_mode<synchronous>, transform_indices = @transform_5, window_bounds = array<i64: 9, 32>}, {pipeline_mode = #tpu.pipeline_mode<synchronous>, transform_indices = @transform_6, window_bounds = array<i64: 9, 1>}, {transform_indices = @transform_7, window_bounds = array<i64: 9, 384>}]} {
    %c0 = arith.constant 0 : index
    %c0_0 = arith.constant 0 : index
    %0 = vector.load %arg1[%c0, %c0_0] : memref<1x384xf32, #tpu.memory_space<vmem>>, vector<1x384xf32>
    %c0_1 = arith.constant 0 : index
    %c0_2 = arith.constant 0 : index
    %1 = vector.load %arg2[%c0_1, %c0_2] : memref<32x1xf32, #tpu.memory_space<vmem>>, vector<32x1xf32>
    %2 = vector.broadcast %1 : vector<32x1xf32> to vector<32x384xf32>
    %3 = vector.broadcast %0 : vector<1x384xf32> to vector<32x384xf32>
    %4 = arith.mulf %2, %3 : vector<32x384xf32>
    %c0_3 = arith.constant 0 : index
    %c0_4 = arith.constant 0 : index
    %5 = vector.load %arg3[%c0_3, %c0_4] : memref<32x1xf32, #tpu.memory_space<vmem>>, vector<32x1xf32>
    %6 = vector.broadcast %5 : vector<32x1xf32> to vector<32x384xf32>
    %7 = arith.addf %4, %6 : vector<32x384xf32>
    %8 = math.tanh %7 : vector<32x384xf32>
    %c0_5 = arith.constant 0 : index
    %c0_6 = arith.constant 0 : index
    %9 = vector.load %arg4[%c0_5, %c0_6] : memref<32x32xf32, #tpu.memory_space<vmem>>, vector<32x32xf32>
    %cst = arith.constant dense<0.000000e+00> : vector<32x384xf32>
    %10 = tpu.matmul %9, %8, %cst {dimension_numbers = #tpu.dot_dimension_numbers<[1], [0], [0], [1], [0, 0, 1, 1], [], []>} : vector<32x32xf32>, vector<32x384xf32>, vector<32x384xf32> -> vector<32x384xf32>
    %c0_7 = arith.constant 0 : index
    %c0_8 = arith.constant 0 : index
    %11 = vector.load %arg5[%c0_7, %c0_8] : memref<32x1xf32, #tpu.memory_space<vmem>>, vector<32x1xf32>
    %12 = vector.broadcast %11 : vector<32x1xf32> to vector<32x384xf32>
    %13 = arith.addf %10, %12 : vector<32x384xf32>
    %14 = math.tanh %13 : vector<32x384xf32>
    %c0_9 = arith.constant 0 : index
    %c0_10 = arith.constant 0 : index
    %15 = vector.load %arg6[%c0_9, %c0_10] : memref<9x32xf32, #tpu.memory_space<vmem>>, vector<9x32xf32>
    %cst_11 = arith.constant dense<0.000000e+00> : vector<9x384xf32>
    %16 = tpu.matmul %15, %14, %cst_11 {dimension_numbers = #tpu.dot_dimension_numbers<[1], [0], [0], [1], [0, 0, 1, 1], [], []>} : vector<9x32xf32>, vector<32x384xf32>, vector<9x384xf32> -> vector<9x384xf32>
    %c0_12 = arith.constant 0 : index
    %c0_13 = arith.constant 0 : index
    %17 = vector.load %arg7[%c0_12, %c0_13] : memref<9x1xf32, #tpu.memory_space<vmem>>, vector<9x1xf32>
    %18 = vector.broadcast %17 : vector<9x1xf32> to vector<9x384xf32>
    %19 = arith.addf %16, %18 : vector<9x384xf32>
    %20 = vector.extract_strided_slice %19 {offsets = [0, 0], sizes = [3, 384], strides = [1, 1]} : vector<9x384xf32> to vector<3x384xf32>
    %cst_14 = arith.constant dense<0xFF800000> : vector<384xf32>
    %21 = vector.multi_reduction <maximumf>, %20, %cst_14 [0] : vector<3x384xf32> to vector<384xf32>
    %22 = vector.shape_cast %21 : vector<384xf32> to vector<1x384xf32>
    %23 = vector.broadcast %22 : vector<1x384xf32> to vector<3x384xf32>
    %24 = arith.subf %20, %23 : vector<3x384xf32>
    %25 = math.exp %24 : vector<3x384xf32>
    %cst_15 = arith.constant dense<0.000000e+00> : vector<384xf32>
    %26 = vector.multi_reduction <add>, %25, %cst_15 [0] : vector<3x384xf32> to vector<384xf32>
    %27 = vector.shape_cast %26 : vector<384xf32> to vector<1x384xf32>
    %28 = vector.broadcast %27 : vector<1x384xf32> to vector<3x384xf32>
    %29 = arith.divf %25, %28 : vector<3x384xf32>
    %c0_16 = arith.constant 0 : index
    %c0_17 = arith.constant 0 : index
    %30 = vector.load %arg8[%c0_16, %c0_17] : memref<9x384xf32, #tpu.memory_space<vmem>>, vector<3x384xf32>
    tpu.vector_store %arg8[%c0_16, %c0_17], %29 {strides = array<i32>} : memref<9x384xf32, #tpu.memory_space<vmem>>, vector<3x384xf32>,
    %31 = vector.extract_strided_slice %19 {offsets = [3, 0], sizes = [3, 384], strides = [1, 1]} : vector<9x384xf32> to vector<3x384xf32>
    %c3 = arith.constant 3 : index
    %c0_18 = arith.constant 0 : index
    %32 = vector.load %arg8[%c3, %c0_18] : memref<9x384xf32, #tpu.memory_space<vmem>>, vector<3x384xf32>
    tpu.vector_store %arg8[%c3, %c0_18], %31 {strides = array<i32>} : memref<9x384xf32, #tpu.memory_space<vmem>>, vector<3x384xf32>,
    %33 = vector.extract_strided_slice %19 {offsets = [6, 0], sizes = [3, 384], strides = [1, 1]} : vector<9x384xf32> to vector<3x384xf32>
    %34 = math.exp %33 : vector<3x384xf32>
    %c6 = arith.constant 6 : index
    %c0_19 = arith.constant 0 : index
    %35 = vector.load %arg8[%c6, %c0_19] : memref<9x384xf32, #tpu.memory_space<vmem>>, vector<3x384xf32>
    tpu.vector_store %arg8[%c6, %c0_19], %34 {strides = array<i32>} : memref<9x384xf32, #tpu.memory_space<vmem>>, vector<3x384xf32>,
    return
  }
  func.func @transform_0(%arg0: i32) -> (i32, i32) {
    %c0_i32 = arith.constant 0 : i32
    %c0_i32_0 = arith.constant 0 : i32
    return %c0_i32, %arg0 : i32, i32
  }
  func.func @transform_1(%arg0: i32) -> (i32, i32) {
    %c0_i32 = arith.constant 0 : i32
    %c0_i32_0 = arith.constant 0 : i32
    %c0_i32_1 = arith.constant 0 : i32
    return %c0_i32, %c0_i32_0 : i32, i32
  }
  func.func @transform_2(%arg0: i32) -> (i32, i32) {
    %c0_i32 = arith.constant 0 : i32
    %c0_i32_0 = arith.constant 0 : i32
    %c0_i32_1 = arith.constant 0 : i32
    return %c0_i32, %c0_i32_0 : i32, i32
  }
  func.func @transform_3(%arg0: i32) -> (i32, i32) {
    %c0_i32 = arith.constant 0 : i32
    %c0_i32_0 = arith.constant 0 : i32
    %c0_i32_1 = arith.constant 0 : i32
    return %c0_i32, %c0_i32_0 : i32, i32
  }
  func.func @transform_4(%arg0: i32) -> (i32, i32) {
    %c0_i32 = arith.constant 0 : i32
    %c0_i32_0 = arith.constant 0 : i32
    %c0_i32_1 = arith.constant 0 : i32
    return %c0_i32, %c0_i32_0 : i32, i32
  }
  func.func @transform_5(%arg0: i32) -> (i32, i32) {
    %c0_i32 = arith.constant 0 : i32
    %c0_i32_0 = arith.constant 0 : i32
    %c0_i32_1 = arith.constant 0 : i32
    return %c0_i32, %c0_i32_0 : i32, i32
  }
  func.func @transform_6(%arg0: i32) -> (i32, i32) {
    %c0_i32 = arith.constant 0 : i32
    %c0_i32_0 = arith.constant 0 : i32
    %c0_i32_1 = arith.constant 0 : i32
    return %c0_i32, %c0_i32_0 : i32, i32
  }
  func.func @transform_7(%arg0: i32) -> (i32, i32) {
    %c0_i32 = arith.constant 0 : i32
    %c0_i32_0 = arith.constant 0 : i32
    return %c0_i32, %arg0 : i32, i32
  }
}

</mosaic_0001>

<bundles_post_ra>
// kernel: tpu_custom_call.1
= control target key start
LH: loop header
LB: loop body
LE: loop exit
PB: predicated region body
PF: predicated region fallthrough
CT: control target
= control target key end

     0   :  { %v811_v2 = vmov 0   ;;  %s963_s0 = inlined_call_operand.vmem [shape: f32[1,384], index: 0, kind: input, shape index: {}]   ;;  %s964_s1 = inlined_call_operand.vmem [shape: f32[32,1], index: 1, kind: input, shape index: {}]   ;;  %s965_s2 = inlined_call_operand.vmem [shape: f32[32,1], index: 2, kind: input, shape index: {}]   ;;  %s966_s3 = inlined_call_operand.vmem [shape: f32[32,32], index: 3, kind: input, shape index: {}]   ;;  %s967_s4 = inlined_call_operand.vmem [shape: f32[32,1], index: 4, kind: input, shape index: {}]   ;;  %s968_s5 = inlined_call_operand.vmem [shape: f32[9,32], index: 5, kind: input, shape index: {}]   ;;  %s969_s6 = inlined_call_operand.vmem [shape: f32[9,1], index: 6, kind: input, shape index: {}]   ;;  %s970_s7 = inlined_call_operand.hbm [shape: f32[9,384], index: 7, kind: output, shape index: {}]  }
   0x1   :  { %v80_v0 = vld [vmem:[%s965_s2] sm:$0xff]  ;;  %714 = vset.pattern.permute.xlu1 %v811_v2  ;;  %713 = vset.pattern.permute.xlu0 %v811_v2  ;;  %v81_v3 = vld [vmem:[%s965_s2 + $0x8] sm:$0xff] }
   0x2   :  { %v28_v1 = vld [vmem:[%s964_s1] sm:$0xff]  ;;  %86 = vperm.xlu1 %714, %v80_v0   ;;  %v29_v4 = vld [vmem:[%s964_s1 + $0x8] sm:$0xff] }
   0x3   :  { %34 = vperm.xlu0 %713, %v28_v1  }
   0x4   :  { %12 = vsyncpa [#allocation3], 0  ;;  %v31_v5 = vld [vmem:[%s964_s1 + $0x18] sm:$0xff]  ;;  %v30_v6 = vld [vmem:[%s964_s1 + $0x10] sm:$0xff]  ;;  %vm156_vm0 = vcmask 261120   ;;  %v812_v16 = vmov 0.0   ;;  %v53_v17 = vlaneseq }
   0x5   :  { %v83_v7 = vld [vmem:[%s965_s2 + $0x18] sm:$0xff]  ;;  %v82_v8 = vld [vmem:[%s965_s2 + $0x10] sm:$0xff]  ;;  %v133_v9 = vld [vmem:[%s967_s4 + $0x8] sm:$0xff]  ;;  %233 = vmatprep.mubr.f32.mxu0 %v812_v16  ;;  %vm527_vm1 = vcmask 1042432  }
   0x6   :  { %91 = vperm.xlu1 %714, %v81_v3   ;;  %v132_v10 = vld [vmem:[%s967_s4] sm:$0xff]  ;;  %v135_v11 = vld [vmem:[%s967_s4 + $0x18] sm:$0xff]  ;;  %v134_v12 = vld [vmem:[%s967_s4 + $0x10] sm:$0xff]  ;;  %v54_v18 = vshrl.u32 %v53_v17, 7 }
   0x7   :  { %39 = vperm.xlu0 %713, %v29_v4   ;;  %v358_v13 = vld [vmem:[%s969_s6 + $0x8] sm:$0x1]  ;;  %v357_v14 = vld [vmem:[%s969_s6] sm:$0xff] }
   0x8   :  { %v901_v15 = vld [vmem:[%s966_s3] sm:$0xff]  ;;  %v55_v19 = vsub.s32 0, %v54_v18  ;;  %v59_v20 = vsub.s32 1, %v54_v18  ;;  %v63_v21 = vsub.s32 2, %v54_v18 }
   0x9   :  { %659 = vmatprep.mubr.msk.f32.mxu1 %vm156_vm0, %v901_v15  ;;  %v27_v22 = vld [vmem:[%s963_s0] sm:$0x7] }
   0xa   :  { %49 = vperm.xlu1 %714, %v31_v5   ;;  %v56_v23 = vrot.slane %v27_v22, %v55_v19  ;;  %v60_v24 = vrot.slane %v27_v22, %v59_v20  ;;  %v64_v25 = vrot.slane %v27_v22, %v63_v21 }
   0xb   :  { %44 = vperm.xlu0 %713, %v30_v6  }
   0xe   :  { %101 = vperm.xlu1 %714, %v83_v7  }
   0xf   :  { %96 = vperm.xlu0 %713, %v82_v8  }
  0x12   :  { %143 = vperm.xlu1 %714, %v133_v9  }
  0x13   :  { %138 = vperm.xlu0 %713, %v132_v10  }
  0x16   :  { %153 = vperm.xlu1 %714, %v135_v11  }
  0x17   :  { %148 = vperm.xlu0 %713, %v134_v12   ;;  %v129_v12 = vld [vmem:[%s966_s3 + $0x8] sm:$0xff] }
  0x1a   :  { %366 = vperm.xlu1 %714, %v358_v13   ;;  %v130_v13 = vld [vmem:[%s966_s3 + $0x10] sm:$0xff] }
  0x1b   :  { %361 = vperm.xlu0 %713, %v357_v14   ;;  %v131_v14 = vld [vmem:[%s966_s3 + $0x18] sm:$0xff] }
  0x81   :  { %v87_v26 = vpop.permute.xlu1 %86 }
  0x82   :  { %v35_v27 = vpop.permute.xlu0 %34 }
  0x83   :  { %v68_v28 = vmul.f32 %v56_v23, %v35_v27  ;;  %v69_v29 = vmul.f32 %v60_v24, %v35_v27  ;;  %v70_v30 = vmul.f32 %v64_v25, %v35_v27 }
  0x85   :  { %v104_v31 = vadd.f32 %v87_v26, %v68_v28  ;;  %v105_v32 = vadd.f32 %v87_v26, %v69_v29  ;;  %v106_v33 = vadd.f32 %v87_v26, %v70_v30  ;;  %v92_v34 = vpop.permute.xlu1 %91 }
  0x86   :  { %v40_v35 = vpop.permute.xlu0 %39 }
  0x87   :  { %v71_v36 = vmul.f32 %v56_v23, %v40_v35  ;;  %v72_v37 = vmul.f32 %v60_v24, %v40_v35  ;;  %v73_v38 = vmul.f32 %v64_v25, %v40_v35  ;;  %715 = vtanh.f32 %v104_v31 }
  0x88   :  { %717 = vtanh.f32 %v105_v32 }
  0x89   :  { %v107_v39 = vadd.f32 %v92_v34, %v71_v36  ;;  %v108_v40 = vadd.f32 %v92_v34, %v72_v37  ;;  %v109_v41 = vadd.f32 %v92_v34, %v73_v38  ;;  %719 = vtanh.f32 %v106_v33  ;;  %v50_v42 = vpop.permute.xlu1 %49 }
  0x8a   :  { %v45_v43 = vpop.permute.xlu0 %44  ;;  %v77_v44 = vmul.f32 %v56_v23, %v50_v42  ;;  %v78_v45 = vmul.f32 %v60_v24, %v50_v42  ;;  %v79_v46 = vmul.f32 %v64_v25, %v50_v42 }
  0x8b   :  { %721 = vtanh.f32 %v107_v39  ;;  %v74_v47 = vmul.f32 %v56_v23, %v45_v43  ;;  %v75_v50 = vmul.f32 %v60_v24, %v45_v43  ;;  %v76_v54 = vmul.f32 %v64_v25, %v45_v43 }
  0x8c   :  { %723 = vtanh.f32 %v108_v40 }
  0x8d   :  { %725 = vtanh.f32 %v109_v41  ;;  %v102_v48 = vpop.permute.xlu1 %101 }
  0x8e   :  { %v97_v49 = vpop.permute.xlu0 %96  ;;  %v113_v51 = vadd.f32 %v102_v48, %v77_v44  ;;  %v114_v52 = vadd.f32 %v102_v48, %v78_v45  ;;  %v115_v53 = vadd.f32 %v102_v48, %v79_v46 }
  0x8f   :  { %v110_v55 = vadd.f32 %v97_v49, %v74_v47  ;;  %v111_v56 = vadd.f32 %v97_v49, %v75_v50  ;;  %v112_v58 = vadd.f32 %v97_v49, %v76_v54 }
  0x90   :  { %727 = vtanh.f32 %v113_v51 }
  0x91   :  { %v716_v57 = vpop.eup %715  ;;  %729 = vtanh.f32 %v114_v52  ;;  %v144_v17 = vpop.permute.xlu1 %143 }
  0x92   :  { %v718_v59 = vpop.eup %717  ;;  %731 = vtanh.f32 %v115_v53  ;;  %v139_v18 = vpop.permute.xlu0 %138 }
  0x93   :  { %v720_v60 = vpop.eup %719  ;;  %733 = vtanh.f32 %v110_v55 }
  0x94   :  { %735 = vtanh.f32 %v111_v56 }
  0x95   :  { %v722_v61 = vpop.eup %721  ;;  %737 = vtanh.f32 %v112_v58  ;;  %v154_v27 = vpop.permute.xlu1 %153 }
  0x96   :  { %v724_v62 = vpop.eup %723  ;;  %v678_v63 = vpack.c.bf16 %v722_v61, %v716_v57  ;;  %v149_v32 = vpop.permute.xlu0 %148 }
  0x97   :  { %v726_v0 = vpop.eup %725  ;;  %v676_v1 = vpack.c.bf16 %v724_v62, %v718_v59  ;;  %v356_v59 = vld [vmem:[%s968_s5 + $0x8] sm:$0x1] }
  0x98   :  { %v684_v2 = vpack.c.bf16 %v726_v0, %v720_v60 }
  0x99   :  { %677 = vmatprep.subr.bf16.mxu0 %v676_v1  ;;  %v367_v0 = vpop.permute.xlu1 %366 }
  0x9a   :  { %685 = vmatprep.subr.bf16.mxu1 %v684_v2  ;;  %679 = vmatpush1.bf16.msra.mxu0 %v678_v63  ;;  %v728_v3 = vpop.eup %727 }
  0x9b   :  { %687 = vmatpush3.bf16.msra.mxu1 %v684_v2  ;;  %v730_v4 = vpop.eup %729  ;;  %v362_v2 = vpop.permute.xlu0 %361 }
  0x9c   :  { %v732_v5 = vpop.eup %731 }
  0x9d   :  { %v734_v6 = vpop.eup %733 }
  0x9e   :  { %v736_v7 = vpop.eup %735  ;;  %v682_v8 = vpack.c.bf16 %v728_v3, %v734_v6 }
  0x9f   :  { %v738_v9 = vpop.eup %737  ;;  %v680_v10 = vpack.c.bf16 %v730_v4, %v736_v7 }
  0xa0   :  { %v688_v11 = vpack.c.bf16 %v732_v5, %v738_v9 }
  0xa1   :  { %681 = vmatprep.subr.bf16.mxu0 %v680_v10 }
  0xa2   :  { %689 = vmatprep.subr.bf16.mxu1 %v688_v11  ;;  %683 = vmatpush1.bf16.msra.mxu0 %v682_v8 }
  0xa3   :  { %691 = vmatpush3.bf16.msra.mxu1 %v688_v11 }
  0xa5   :  { %625 = vmatmul.mubr.msk.f32.vlgmr.msra.gmra.mrb[0].mxu0 %vm156_vm0, %v901_v15  ;;  %v933_v15 = vld [vmem:[%s968_s5] sm:$0xff]  ;;  %s813_s5 = smov [#allocation2]  }
  0xa6   :  { %660 = vmatmul.mubr.msk.f32.vlgmr.msra.gmra.mrb[0].mxu1 %vm156_vm0, %v129_v12  ;;  %239 = vmatprep.mubr.f32.mxu0 %v812_v16  ;;  %s614_s14 = sshll.u32 %s813_s5, 4  ;;  %s615_s14 = int_to_ptr.vmem [resolvable:$true] %s614_s14 }
  0xa7   :  { %662 = vmatprep.mubr.msk.f32.mxu1 %vm156_vm0, %v130_v13  ;;  %s787_s15 = scalar_lea.vmem %s615_s14, 768  ;;  %p792_p1 = scmp.lt.s32.totalorder %s615_s14, %s615_s14 }
  0xa8   :  { %p788_p0 = scmp.ne.s32.totalorder %s615_s14, %s787_s15  ;;  %p793_p2 = scmp.lt.s32.totalorder %s787_s15, %s787_s15 }
  0xa9   :  { %626 = vmatmul.mubr.msk.f32.gmra.mrb[2].mxu0 %vm156_vm0, %v129_v12 }
  0xaa   :  { %663 = vmatmul.mubr.msk.f32.gmra.mrb[2].mxu1 %vm156_vm0, %v131_v14  ;;  %245 = vmatprep.mubr.f32.mxu0 %v812_v16  ;;  %p794_p3 = por %p793_p2, %p792_p1 }
  0xab   :  { %439 = vmatprep.mubr.f32.mxu1 %v812_v16 }
  0xac   :  { %p795_p4 = pnand %p794_p3, %p788_p0 }
  0xad   :  { %627 = vmatmul.mubr.msk.f32.gmra.mrb[4].mxu0 %vm156_vm0, %v130_v13 }
  0xae   :  { %251 = vmatprep.mubr.f32.mxu0 %v812_v16 }
  0xb1   :  { %628 = vmatmul.mubr.msk.f32.gmra.mrb[6].mxu0 %vm156_vm0, %v131_v14 }
  0xb2   :  { %673 = vmatprep.mubr.msk.f32.mxu0 %vm156_vm0, %v933_v15 }
 0x178   :  { %v235_v19 = vpop.f32.mrb[0].mxu0 }
 0x179   :  { %v236_v20 = vadd.f32 %v235_v19, %v139_v18  ;;  %v661_v21 = vpop.f32.mrb[0].mxu1  ;;  %v237_v22 = vpop.f32.mrb[1].mxu0 }
 0x17a   :  { %v330_v23 = vadd.f32 %v661_v21, %v144_v17  ;;  %v238_v24 = vadd.f32 %v237_v22, %v139_v18  ;;  %v324_v25 = vpop.f32.mrb[1].mxu1 }
 0x17b   :  { %739 = vtanh.f32 %v236_v20  ;;  %v325_v26 = vadd.f32 %v324_v25, %v139_v18 }
 0x17c   :  { %741 = vtanh.f32 %v330_v23  ;;  %v241_v28 = vpop.f32.mrb[2].mxu0 }
 0x17d   :  { %743 = vtanh.f32 %v238_v24  ;;  %v242_v29 = vadd.f32 %v241_v28, %v144_v17  ;;  %v664_v30 = vpop.f32.mrb[2].mxu1  ;;  %v243_v31 = vpop.f32.mrb[3].mxu0 }
 0x17e   :  { %745 = vtanh.f32 %v325_v26  ;;  %v340_v33 = vadd.f32 %v664_v30, %v154_v27  ;;  %v244_v34 = vadd.f32 %v243_v31, %v144_v17  ;;  %v334_v35 = vpop.f32.mrb[3].mxu1 }
 0x17f   :  { %747 = vtanh.f32 %v242_v29  ;;  %v335_v36 = vadd.f32 %v334_v35, %v149_v32 }
 0x180   :  { %749 = vtanh.f32 %v340_v33  ;;  %v247_v37 = vpop.f32.mrb[4].mxu0 }
 0x181   :  { %751 = vtanh.f32 %v244_v34  ;;  %v248_v38 = vadd.f32 %v247_v37, %v149_v32  ;;  %v249_v39 = vpop.f32.mrb[5].mxu0 }
 0x182   :  { %753 = vtanh.f32 %v335_v36  ;;  %v250_v40 = vadd.f32 %v249_v39, %v149_v32 }
 0x183   :  { %755 = vtanh.f32 %v248_v38 }
 0x184   :  { %v253_v41 = vpop.f32.mrb[6].mxu0  ;;  %757 = vtanh.f32 %v250_v40 }
 0x185   :  { %v740_v42 = vpop.eup %739  ;;  %v254_v43 = vadd.f32 %v253_v41, %v154_v27  ;;  %v255_v44 = vpop.f32.mrb[7].mxu0 }
 0x186   :  { %v742_v45 = vpop.eup %741  ;;  %v256_v46 = vadd.f32 %v255_v44, %v154_v27 }
 0x187   :  { %v744_v47 = vpop.eup %743  ;;  %759 = vtanh.f32 %v254_v43 }
 0x188   :  { %v746_v48 = vpop.eup %745  ;;  %761 = vtanh.f32 %v256_v46 }
 0x189   :  { %v748_v49 = vpop.eup %747  ;;  %v700_v50 = vpack.c.bf16 %v742_v45, %v746_v48 }
 0x18a   :  { %v750_v51 = vpop.eup %749  ;;  %v694_v52 = vpack.c.bf16 %v748_v49, %v740_v42 }
 0x18b   :  { %v752_v53 = vpop.eup %751  ;;  %701 = vmatprep.subr.bf16.mxu0 %v700_v50 }
 0x18c   :  { %v754_v54 = vpop.eup %753  ;;  %703 = vmatpush3.bf16.msra.mxu0 %v700_v50  ;;  %v692_v55 = vpack.c.bf16 %v752_v53, %v744_v47 }
 0x18d   :  { %v704_v56 = vpack.c.bf16 %v750_v51, %v754_v54  ;;  %v756_v57 = vpop.eup %755 }
 0x18e   :  { %693 = vmatprep.subr.bf16.mxu1 %v692_v55  ;;  %v758_v58 = vpop.eup %757 }
 0x18f   :  { %705 = vmatprep.subr.bf16.mxu0 %v704_v56  ;;  %695 = vmatpush1.bf16.msra.mxu1 %v694_v52 }
 0x190   :  { %707 = vmatpush3.bf16.msra.mxu0 %v704_v56 }
 0x191   :  { %v760_v60 = vpop.eup %759 }
 0x192   :  { %v762_v61 = vpop.eup %761  ;;  %v698_v62 = vpack.c.bf16 %v760_v60, %v756_v57 }
 0x193   :  { %674 = vmatmul.mubr.msk.f32.vlgmr.msra.gmra.mrb[8].mxu0 %vm156_vm0, %v356_v59  ;;  %v696_v63 = vpack.c.bf16 %v762_v61, %v758_v58 }
 0x195   :  { %697 = vmatprep.subr.bf16.mxu1 %v696_v63 }
 0x196   :  { %699 = vmatpush1.bf16.msra.mxu1 %v698_v62 }
 0x199   :  { %633 = vmatmul.mubr.msk.f32.vlgmr.msra.gmra.mrb[4].mxu1 %vm156_vm0, %v933_v15 }
 0x19a   :  { %445 = vmatprep.mubr.f32.mxu1 %v812_v16 }
 0x19d   :  { %634 = vmatmul.mubr.msk.f32.gmra.mrb[6].mxu1 %vm156_vm0, %v356_v59 }
 0x266   :  { %v675_v1 = vpop.f32.mrb[8].mxu0 }
 0x267   :  { %v524_v3 = vadd.f32 %v675_v1, %v367_v0  ;;  %v518_v4 = vpop.f32.mrb[9].mxu0 }
 0x268   :  { %v519_v5 = vadd.f32 %v518_v4, %v362_v2 }
 0x269   :  { %v601_v6 = vmul.f32 1.442695, %v524_v3 }
 0x26a   :  { %v542_v7 = vsel %vm527_vm1, %v519_v5, -inf  ;;  %590 = vst [vmem:[#allocation2 + $0x10] sm:$0x38] %v519_v5  ;;  %v595_v8 = vmul.f32 1.442695, %v519_v5 }
 0x26b   :  { %763 = vpow2.f32 %v601_v6  ;;  %v543_v9 = vrot.slane %v542_v7, 4 }
 0x26c   :  { %765 = vpow2.f32 %v595_v8  ;;  %v441_v10 = vpop.f32.mrb[4].mxu1 }
 0x26d   :  { %v544_v11 = vmax.f32 %v542_v7, %v543_v9  ;;  %v442_v16 = vadd.f32 %v441_v10, %v362_v2  ;;  %v443_v12 = vpop.f32.mrb[5].mxu1 }
 0x26e   :  { %v444_v13 = vadd.f32 %v443_v12, %v362_v2 }
 0x26f   :  { %v545_v14 = vrot.slane %v544_v11, 2  ;;  %v528_v15 = vsel %vm527_vm1, %v442_v16, -inf  ;;  %588 = vst [vmem:[#allocation2] sm:$0x38] %v442_v16  ;;  %v591_v17 = vmul.f32 1.442695, %v442_v16 }
 0x270   :  { %v529_v18 = vrot.slane %v528_v15, 4  ;;  %v535_v19 = vsel %vm527_vm1, %v444_v13, -inf  ;;  %589 = vst [vmem:[#allocation2 + $0x8] sm:$0x38] %v444_v13  ;;  %v593_v20 = vmul.f32 1.442695, %v444_v13 }
 0x271   :  { %v447_v21 = vpop.f32.mrb[6].mxu1  ;;  %v546_v22 = vmax.f32 %v544_v11, %v545_v14  ;;  %767 = vpow2.f32 %v591_v17  ;;  %v536_v23 = vrot.slane %v535_v19, 4 }
 0x272   :  { %v448_v24 = vadd.f32 %v447_v21, %v367_v0  ;;  %v449_v25 = vpop.f32.mrb[7].mxu1  ;;  %v530_v26 = vmax.f32 %v528_v15, %v529_v18  ;;  %769 = vpow2.f32 %v593_v20 }
 0x273   :  { %v450_v27 = vadd.f32 %v449_v25, %v367_v0  ;;  %v547_v28 = vrot.slane %v546_v22, 1  ;;  %v537_v29 = vmax.f32 %v535_v19, %v536_v23 }
 0x274   :  { %v597_v30 = vmul.f32 1.442695, %v448_v24  ;;  %v531_v31 = vrot.slane %v530_v26, 2 }
 0x275   :  { %v599_v32 = vmul.f32 1.442695, %v450_v27  ;;  %v764_v33 = vpop.eup %763  ;;  %v548_v34 = vmax.f32 %v546_v22, %v547_v28  ;;  %v538_v35 = vrot.slane %v537_v29, 2 }
 0x276   :  { %771 = vpow2.f32 %v597_v30  ;;  %v766_v36 = vpop.eup %765  ;;  %608 = vst [vmem:[#allocation2 + $0x28] sm:$0x1] %v764_v33  ;;  %v532_v37 = vmax.f32 %v530_v26, %v531_v31 }
 0x277   :  { %773 = vpow2.f32 %v599_v32  ;;  %v551_v38 = vsub.f32 %v519_v5, %v548_v34  ;;  %605 = vst [vmem:[#allocation2 + $0x10] sm:$0xc0] %v766_v36  ;;  %v539_v39 = vmax.f32 %v537_v29, %v538_v35 }
 0x278   :  { %v533_v40 = vrot.slane %v532_v37, 1 }
 0x279   :  { %v556_v41 = vmul.f32 1.442695, %v551_v38  ;;  %v540_v42 = vrot.slane %v539_v39, 1 }
 0x27a   :  { %v534_v43 = vmax.f32 %v532_v37, %v533_v40 }
 0x27b   :  { %v768_v44 = vpop.eup %767  ;;  %775 = vpow2.f32 %v556_v41  ;;  %v541_v45 = vmax.f32 %v539_v39, %v540_v42 }
 0x27c   :  { %v770_v46 = vpop.eup %769  ;;  %v549_v47 = vsub.f32 %v442_v16, %v534_v43  ;;  %603 = vst [vmem:[#allocation2] sm:$0xc0] %v768_v44 }
 0x27d   :  { %v550_v48 = vsub.f32 %v444_v13, %v541_v45  ;;  %604 = vst [vmem:[#allocation2 + $0x8] sm:$0xc0] %v770_v46 }
 0x27e   :  { %v552_v49 = vmul.f32 1.442695, %v549_v47 }
 0x27f   :  { %v554_v51 = vmul.f32 1.442695, %v550_v48 }
 0x280   :  { %v772_v50 = vpop.eup %771  ;;  %777 = vpow2.f32 %v552_v49 }
 0x281   :  { %v774_v52 = vpop.eup %773  ;;  %606 = vst [vmem:[#allocation2 + $0x18] sm:$0x1] %v772_v50  ;;  %779 = vpow2.f32 %v554_v51 }
 0x282   :  { %607 = vst [vmem:[#allocation2 + $0x20] sm:$0x1] %v774_v52 }
 0x285   :  { %v776_v53 = vpop.eup %775 }
 0x286   :  { %v572_v54 = vsel %vm527_vm1, %v776_v53, 0.0 }
 0x287   :  { %v573_v55 = vrot.slane %v572_v54, 4 }
 0x289   :  { %v574_v56 = vadd.f32 %v573_v55, %v572_v54 }
 0x28a   :  { %v778_v57 = vpop.eup %777 }
 0x28b   :  { %v780_v58 = vpop.eup %779  ;;  %v575_v59 = vrot.slane %v574_v56, 2  ;;  %v558_v60 = vsel %vm527_vm1, %v778_v57, 0.0 }
 0x28c   :  { %v559_v61 = vrot.slane %v558_v60, 4  ;;  %v565_v62 = vsel %vm527_vm1, %v780_v58, 0.0 }
 0x28d   :  { %v576_v63 = vadd.f32 %v575_v59, %v574_v56  ;;  %v566_v0 = vrot.slane %v565_v62, 4 }
 0x28e   :  { %v560_v1 = vadd.f32 %v559_v61, %v558_v60 }
 0x28f   :  { %v577_v2 = vrot.slane %v576_v63, 1  ;;  %v567_v3 = vadd.f32 %v566_v0, %v565_v62 }
 0x290   :  { %v561_v4 = vrot.slane %v560_v1, 2 }
 0x291   :  { %v578_v5 = vadd.f32 %v577_v2, %v576_v63  ;;  %v568_v6 = vrot.slane %v567_v3, 2 }
 0x292   :  { %v562_v7 = vadd.f32 %v561_v4, %v560_v1 }
 0x293   :  { %781 = vrcp.f32 %v578_v5  ;;  %v569_v8 = vadd.f32 %v568_v6, %v567_v3 }
 0x294   :  { %v563_v9 = vrot.slane %v562_v7, 1 }
 0x295   :  { %v570_v10 = vrot.slane %v569_v8, 1 }
 0x296   :  { %v564_v11 = vadd.f32 %v563_v9, %v562_v7 }
 0x297   :  { %v571_v16 = vadd.f32 %v570_v10, %v569_v8 }
 0x298   :  { %783 = vrcp.f32 %v564_v11 }
 0x299   :  { %785 = vrcp.f32 %v571_v16 }
 0x29d   :  { %v782_v12 = vpop.eup %781 }
 0x29e   :  { %v584_v13 = vmul.f32 %v782_v12, %v776_v53 }
 0x2a0   :  { %587 = vst [vmem:[#allocation2 + $0x10] sm:$0x7] %v584_v13 }
 0x2a2   :  { %v784_v14 = vpop.eup %783 }
 0x2a3   :  { %v786_v15 = vpop.eup %785  ;;  %v580_v17 = vmul.f32 %v784_v14, %v778_v57 }
 0x2a4   :  { %v582_v18 = vmul.f32 %v786_v15, %v780_v58 }
 0x2a5   :  { %585 = vst [vmem:[#allocation2] sm:$0x7] %v580_v17 }
 0x2a6   :  { %586 = vst [vmem:[#allocation2 + $0x8] sm:$0x7] %v582_v18 }
 0x2a7   :  { %798 = shalt.err (!%p795_p4)
}
 0x2a8   :  { %s799_s18 = scalar_lea.hbm %s970_s7, 768 }
 0x2a9   :  { %p800_p5 = scmp.ne.s32.totalorder %s970_s7, %s799_s18  ;;  %p803_p6 = scmp.lt.u32.totalorder %s799_s18, %s970_s7 }
 0x2ab   :  { %p805_p7 = pnand %p803_p6, %p800_p5 }
 0x2ad   :  { %808 = shalt.err (!%p805_p7)
}
 0x2ae   :  { %s814_s22 = smov 384   ;;  %s815_s23 = smov 24  }
 0x2af   :  { %620 = dma.vmem_to_hbm [thread:$0]  %s615_s14, 768, %s970_s7, [#allocation3], %s814_s22, %s814_s22, %s815_s23  }
 0x2b0   :  { %809 = dma.done.wait [#allocation3], 768  }
 0x2b1   :  { %810 = vsyncadd [#allocation3], 4294966528 }
 0x2b2   :  { %624 = vsyncpa [#allocation3], 1 }

</bundles_post_ra>
